<compile_context>
chip_gen: v6e
topology: v6e:2x2x1
jax: 0.10.0
libtpu: 0.0.40
codegen_flags: <defaults>
</compile_context>

<pallas_src>
import functools

import jax
import jax.numpy as jnp
import numpy as np
from jax.experimental import pallas as pl
from jax.experimental.pallas import tpu as pltpu

LN_EPS = 1e-5  # PyTorch nn.LayerNorm default


def _round_up(x, m):
    return (x + m - 1) // m * m


def _vmem_capacity_bytes(default=64 << 20):
    """Best-effort physical VMEM query; falls back to the v7x size (64 MiB)."""
    try:
        info = pltpu.get_tpu_info()
        cap = getattr(info, "vmem_capacity_bytes", None)
        if cap:
            return int(cap)
    except Exception:
        pass
    return default


# -----------------------------------------------------------------------------
# Kernel
# -----------------------------------------------------------------------------
def classifier_kernel(x_ref, w_ref, b_ref, o_ref, xn_ref, *, true_d, eps):
    # x_ref:  (TB, D)   input rows (full feature extent)
    # w_ref:  (D, TC)   folded weight tile (gamma already folded in)
    # b_ref:  (1, TC)   folded bias tile (beta @ W^T + b), f32
    # o_ref:  (TB, TC)  output tile
    # xn_ref: (TB, D)   VMEM scratch: normalized x in matmul dtype, cached
    #                   across the inner (class) grid axis.

    # LayerNorm once per batch tile (first class tile only).  Subsequent class
    # tiles reuse the cached normalized activations -> the XLU reductions, EUP
    # rsqrt, VPU normalization and the f32->bf16 cast are not redone per tile.
    @pl.when(pl.program_id(1) == 0)
    def _():
        x = x_ref[...].astype(jnp.float32)
        inv_d = jnp.float32(1.0 / true_d)
        s = jnp.sum(x, axis=-1, keepdims=True)
        sq = jnp.sum(x * x, axis=-1, keepdims=True)
        mean = s * inv_d
        # Clamp: E[x^2] - mean^2 can cancel slightly negative for large-mean
        # inputs; without the clamp rsqrt(neg + eps) could NaN.
        var = jnp.maximum(sq * inv_d - mean * mean, 0.0)
        inv = jax.lax.rsqrt(var + eps)
        # gamma/beta are folded into w_ref / b_ref, so this is the full LN.
        xn_ref[...] = ((x - mean) * inv).astype(xn_ref.dtype)

    # MXU matmul: narrow operands (bf16 by default), f32 accumulation.
    y = jnp.dot(xn_ref[...], w_ref[...], preferred_element_type=jnp.float32)
    o_ref[...] = (y + b_ref[...]).astype(o_ref.dtype)


# -----------------------------------------------------------------------------
# One-time parameter preparation (hoist out of the per-call path)
# -----------------------------------------------------------------------------
def prepare_classifier_params(gamma, beta, weight, bias, *,
                              matmul_dtype=jnp.bfloat16):
    """Fold LayerNorm affine into the linear layer and lay out for the kernel.

      ((x - mu)*inv * gamma + beta) @ W^T + b
    = ((x - mu)*inv) @ (gamma[:,None] * W^T) + (beta @ W^T + b)

    Returns a dict consumed by `classifier_forward`.  Call once when the
    parameters are set; do NOT call per forward pass.
    """
    C, D = weight.shape
    gamma_f = gamma.astype(jnp.float32)
    beta_f = beta.astype(jnp.float32)
    w_t = weight.astype(jnp.float32).T                   # (D, C)
    w_folded = gamma_f[:, None] * w_t                    # (D, C)
    b_folded = beta_f @ w_t + bias.astype(jnp.float32)   # (C,)

    # Class-tile width: multiple of 128 for lane-dense weight/output tiles
    # (and never larger than C, so edge blocks only happen on the last tile).
    if C < 128:
        tile_c = C          # full extent; legal without the 128 rule
        c_pad = C
    else:
        max_tc = (C // 128) * 128
        desired = 128 if D >= 32768 else 256   # keep weight tiles modest for huge D
        tile_c = min(desired, max_tc)
        c_pad = _round_up(C, tile_c)

    if c_pad != C:
        # Zero columns: contribute zero logits and are masked on store anyway.
        w_folded = jnp.pad(w_folded, ((0, 0), (0, c_pad - C)))
        b_folded = jnp.pad(b_folded, (0, c_pad - C))

    w_folded = w_folded.astype(matmul_dtype)             # (D, c_pad)
    b_folded = b_folded.reshape(1, c_pad).astype(jnp.float32)

    return {"w": w_folded, "b": b_folded, "num_classes": C, "dim": D,
            "tile_c": tile_c}


# -----------------------------------------------------------------------------
# Forward wrapper
# -----------------------------------------------------------------------------
def classifier_forward(x, params, *, tile_b=None, out_dtype=None, eps=LN_EPS):
    """forward(x) = Linear(LayerNorm(x)) using pre-folded params."""
    w, b = params["w"], params["b"]
    C, D, tile_c = params["num_classes"], params["dim"], params["tile_c"]
    B, Dx = x.shape
    assert Dx == D, f"feature dim mismatch: x has {Dx}, params expect {D}"
    c_pad = w.shape[1]
    out_dtype = x.dtype if out_dtype is None else out_dtype

    x_bytes = np.dtype(x.dtype).itemsize
    mm_bytes = np.dtype(w.dtype).itemsize
    out_bytes = np.dtype(out_dtype).itemsize

    # ---- VMEM-budgeted tiling -----------------------------------------------
    vmem_cap = _vmem_capacity_bytes()                       # 128 MiB (v5e/v6e), 64 MiB (v7x)
    vmem_limit = int(min(vmem_cap - (4 << 20), vmem_cap * 0.9))
    tile_budget = int(vmem_limit * 0.85)                    # headroom for compiler scratch

    if tile_b is None:
        # Footprint: 2x double-buffered x (input dtype) + xn scratch (matmul
        # dtype) + 2x double-buffered weight tile + 2x output tile.
        w_buf = 2 * D * tile_c * mm_bytes + 2 * tile_c * 4
        per_row = 2 * D * x_bytes + D * mm_bytes + 2 * tile_c * out_bytes
        rows = max(8, (tile_budget - w_buf) // max(per_row, 1))
        # Larger batch tiles => fewer re-streams of the folded weight from HBM
        # (dominant HBM stream for classifier heads), capped for sanity.
        tile_b = int(min(rows, 1024, B))
    tile_b = min(int(tile_b), B)
    if tile_b < B:
        tile_b = max(8, (tile_b // 8) * 8)   # sublane-aligned unless full extent

    grid = (pl.cdiv(B, tile_b), c_pad // tile_c)
    kernel = functools.partial(classifier_kernel, true_d=D, eps=eps)

    # TODO(synk): when C is huge and B small, a (class-outer, batch-inner)
    # grid that streams x instead of the weight would cut HBM traffic further.
    return pl.pallas_call(
        kernel,
        out_shape=jax.ShapeDtypeStruct((B, C), out_dtype),
        grid_spec=pltpu.PrefetchScalarGridSpec(
            num_scalar_prefetch=0,
            grid=grid,
            in_specs=[
                # x tile: full feature extent, invariant over the class axis
                # -> fetched once per batch tile.
                pl.BlockSpec((tile_b, D), lambda i, j: (i, 0)),
                # Folded weight: streamed in (D, tile_c) tiles.
                pl.BlockSpec((D, tile_c), lambda i, j: (0, j)),
                # Folded bias tile.
                pl.BlockSpec((1, tile_c), lambda i, j: (0, j)),
            ],
            out_specs=pl.BlockSpec((tile_b, tile_c), lambda i, j: (i, j)),
            # Cached normalized activations, persistent across the class axis.
            scratch_shapes=[pltpu.VMEM((tile_b, D), w.dtype)],
        ),
        compiler_params=pltpu.CompilerParams(
            # Batch axis parallel (megacore / 2-TC sharding); class axis must
            # be arbitrary because the xn scratch carries state across it.
            dimension_semantics=("parallel", "arbitrary"),
            vmem_limit_bytes=vmem_limit,
        ),
    )(x, w, b)


# -----------------------------------------------------------------------------
# Pure-JAX reference (mirrors the PyTorch module)
# -----------------------------------------------------------------------------
def reference_forward(x, gamma, beta, weight, bias):
    xf = x.astype(jnp.float32)
    mean = jnp.mean(xf, axis=-1, keepdims=True)
    var = jnp.mean((xf - mean) ** 2, axis=-1, keepdims=True)
    xn = (xf - mean) / jnp.sqrt(var + LN_EPS)
    xn = xn * gamma + beta
    return xn @ weight.T + bias


if __name__ == "__main__":
    # Small shapes consistent with the module: x is (batch, dim).
    B, D, C = 8, 32, 16

    key = jax.random.PRNGKey(0)
    kx, kw, kb, kg, kbe = jax.random.split(key, 5)

    x = jax.random.normal(kx, (B, D), dtype=jnp.float32)

    # Non-trivial LN affine so the gamma/beta folding is actually exercised.
    gamma = 1.0 + 0.1 * jax.random.normal(kg, (D,), dtype=jnp.float32)
    beta = 0.1 * jax.random.normal(kbe, (D,), dtype=jnp.float32)
    bound = 1.0 / (D ** 0.5)
    weight = jax.random.uniform(kw, (C, D), minval=-bound, maxval=bound,
                                dtype=jnp.float32)
    bias = jax.random.uniform(kb, (C,), minval=-bound, maxval=bound,
                              dtype=jnp.float32)

    ref = reference_forward(x, gamma, beta, weight, bias)

    # One-time parameter prep (hoisted out of the per-call path).
    params_bf16 = prepare_classifier_params(gamma, beta, weight, bias)
    out = jax.block_until_ready(classifier_forward(x, params_bf16))
    assert out.shape == (B, C)
    assert jnp.allclose(out, ref, atol=5e-2, rtol=5e-2), \
        "bf16-operand path mismatch vs reference"

    # f32-operand path for tighter numerical validation of the kernel algebra.
    params_f32 = prepare_classifier_params(gamma, beta, weight, bias,
                                           matmul_dtype=jnp.float32)
    out_f32 = jax.block_until_ready(classifier_forward(x, params_f32))
    assert out_f32.shape == (B, C)
    assert jnp.allclose(out_f32, ref, atol=1e-4, rtol=1e-4), \
        "f32 path mismatch vs reference"

    print("KERNEL_OK")
</pallas_src>

<mosaic_0001>
module attributes {stable_mosaic.version = 11 : i64} {
  func.func @classifier_kernel(%arg0: i32, %arg1: i32, %arg2: memref<8x32xf32, #tpu.memory_space<vmem>>, %arg3: memref<32x16xbf16, #tpu.memory_space<vmem>>, %arg4: memref<1x16xf32, #tpu.memory_space<vmem>>, %arg5: memref<8x16xf32, #tpu.memory_space<vmem>>, %arg6: memref<8x32xbf16, #tpu.memory_space<vmem>>) attributes {dimension_semantics = [#tpu.dimension_semantics<parallel>, #tpu.dimension_semantics<arbitrary>], iteration_bounds = array<i64: 1, 1>, scalar_prefetch = 0 : i64, scratch_operands = 1 : i64, tpu.core_type = #tpu.core_type<tc>, window_params = [{transform_indices = @transform_0, window_bounds = array<i64: 8, 32>}, {transform_indices = @transform_1, window_bounds = array<i64: 32, 16>}, {transform_indices = @transform_2, window_bounds = array<i64: 1, 16>}, {transform_indices = @transform_3, window_bounds = array<i64: 8, 16>}]} {
    %c0_i32 = arith.constant 0 : i32
    %0 = arith.cmpi eq, %arg1, %c0_i32 : i32
    %1 = arith.extui %0 : i1 to i32
    %c0_i32_0 = arith.constant 0 : i32
    %2 = arith.cmpi ne, %1, %c0_i32_0 : i32
    scf.if %2 {
      %c0_8 = arith.constant 0 : index
      %c0_9 = arith.constant 0 : index
      %10 = vector.load %arg2[%c0_8, %c0_9] : memref<8x32xf32, #tpu.memory_space<vmem>>, vector<8x32xf32>
      %cst_10 = arith.constant dense<0.000000e+00> : vector<8xf32>
      %11 = vector.multi_reduction <add>, %10, %cst_10 [1] : vector<8x32xf32> to vector<8xf32>
      %12 = vector.shape_cast %11 : vector<8xf32> to vector<8x1xf32>
      %13 = arith.mulf %10, %10 : vector<8x32xf32>
      %cst_11 = arith.constant dense<0.000000e+00> : vector<8xf32>
      %14 = vector.multi_reduction <add>, %13, %cst_11 [1] : vector<8x32xf32> to vector<8xf32>
      %15 = vector.shape_cast %14 : vector<8xf32> to vector<8x1xf32>
      %cst_12 = arith.constant 3.125000e-02 : f32
      %16 = vector.broadcast %cst_12 : f32 to vector<8x1xf32>
      %17 = arith.mulf %12, %16 : vector<8x1xf32>
      %cst_13 = arith.constant 3.125000e-02 : f32
      %18 = vector.broadcast %cst_13 : f32 to vector<8x1xf32>
      %19 = arith.mulf %15, %18 : vector<8x1xf32>
      %20 = arith.mulf %17, %17 : vector<8x1xf32>
      %21 = arith.subf %19, %20 : vector<8x1xf32>
      %cst_14 = arith.constant 0.000000e+00 : f32
      %22 = vector.broadcast %cst_14 : f32 to vector<8x1xf32>
      %23 = arith.maximumf %21, %22 : vector<8x1xf32>
      %cst_15 = arith.constant 9.99999974E-6 : f32
      %24 = vector.broadcast %cst_15 : f32 to vector<8x1xf32>
      %25 = arith.addf %23, %24 : vector<8x1xf32>
      %26 = math.rsqrt %25 : vector<8x1xf32>
      %27 = vector.broadcast %17 : vector<8x1xf32> to vector<8x32xf32>
      %28 = arith.subf %10, %27 : vector<8x32xf32>
      %29 = vector.broadcast %26 : vector<8x1xf32> to vector<8x32xf32>
      %30 = arith.mulf %28, %29 : vector<8x32xf32>
      %31 = arith.truncf %30 : vector<8x32xf32> to vector<8x32xbf16>
      %c0_16 = arith.constant 0 : index
      %c0_17 = arith.constant 0 : index
      %32 = vector.load %arg6[%c0_16, %c0_17] : memref<8x32xbf16, #tpu.memory_space<vmem>>, vector<8x32xbf16>
      tpu.vector_store %arg6[%c0_16, %c0_17], %31 {strides = array<i32>} : memref<8x32xbf16, #tpu.memory_space<vmem>>, vector<8x32xbf16>,
    } else {
    }
    %c0 = arith.constant 0 : index
    %c0_1 = arith.constant 0 : index
    %3 = vector.load %arg6[%c0, %c0_1] : memref<8x32xbf16, #tpu.memory_space<vmem>>, vector<8x32xbf16>
    %c0_2 = arith.constant 0 : index
    %c0_3 = arith.constant 0 : index
    %4 = vector.load %arg3[%c0_2, %c0_3] : memref<32x16xbf16, #tpu.memory_space<vmem>>, vector<32x16xbf16>
    %cst = arith.constant dense<0.000000e+00> : vector<8x16xf32>
    %5 = tpu.matmul %3, %4, %cst {dimension_numbers = #tpu.dot_dimension_numbers<[1], [0], [0], [1], [0, 0, 1, 1], [], []>} : vector<8x32xbf16>, vector<32x16xbf16>, vector<8x16xf32> -> vector<8x16xf32>
    %c0_4 = arith.constant 0 : index
    %c0_5 = arith.constant 0 : index
    %6 = vector.load %arg4[%c0_4, %c0_5] : memref<1x16xf32, #tpu.memory_space<vmem>>, vector<1x16xf32>
    %7 = vector.broadcast %6 : vector<1x16xf32> to vector<8x16xf32>
    %8 = arith.addf %5, %7 : vector<8x16xf32>
    %c0_6 = arith.constant 0 : index
    %c0_7 = arith.constant 0 : index
    %9 = vector.load %arg5[%c0_6, %c0_7] : memref<8x16xf32, #tpu.memory_space<vmem>>, vector<8x16xf32>
    tpu.vector_store %arg5[%c0_6, %c0_7], %8 {strides = array<i32>} : memref<8x16xf32, #tpu.memory_space<vmem>>, vector<8x16xf32>,
    return
  }
  func.func @transform_0(%arg0: i32, %arg1: i32) -> (i32, i32) {
    %c0_i32 = arith.constant 0 : i32
    %c0_i32_0 = arith.constant 0 : i32
    return %arg0, %c0_i32 : i32, i32
  }
  func.func @transform_1(%arg0: i32, %arg1: i32) -> (i32, i32) {
    %c0_i32 = arith.constant 0 : i32
    %c0_i32_0 = arith.constant 0 : i32
    return %c0_i32, %arg1 : i32, i32
  }
  func.func @transform_2(%arg0: i32, %arg1: i32) -> (i32, i32) {
    %c0_i32 = arith.constant 0 : i32
    %c0_i32_0 = arith.constant 0 : i32
    return %c0_i32, %arg1 : i32, i32
  }
  func.func @transform_3(%arg0: i32, %arg1: i32) -> (i32, i32) {
    %c0_i32 = arith.constant 0 : i32
    return %arg0, %arg1 : i32, i32
  }
}

</mosaic_0001>

<bundles_post_ra>
// kernel: tpu_custom_call.1
= control target key start
LH: loop header
LB: loop body
LE: loop exit
PB: predicated region body
PF: predicated region fallthrough
CT: control target
= control target key end

     0   :  { %vm21_vm0 = vcmask 261120   ;;  %s210_s0 = inlined_call_operand.vmem [shape: f32[8,32], index: 0, kind: input, shape index: {}]   ;;  %s211_s1 = inlined_call_operand.vmem [shape: bf16[32,16], index: 1, kind: input, shape index: {}]   ;;  %s212_s2 = inlined_call_operand.vmem [shape: f32[1,16], index: 2, kind: input, shape index: {}]   ;;  %s213_s3 = inlined_call_operand.hbm [shape: f32[8,16], index: 3, kind: output, shape index: {}]  }
   0x1   :  { %v20_v0 = vld [vmem:[%s210_s0] sm:$0xff] }
   0x2   :  { %v22_v1 = vsel %vm21_vm0, %v20_v0, 0.0  ;;  %v25_v2 = vmul.f32 %v20_v0, %v20_v0 }
   0x3   :  { %23 = vadd.xlane.f32.xlu0 %v22_v1 }
   0x4   :  { %8 = vsyncpa [#allocation4], 0  ;;  %v26_v3 = vsel %vm21_vm0, %v25_v2, 0.0  ;;  %v143_v4 = vld [vmem:[%s211_s1 + $0x8] sm:$0xff]   ;;  %v169_v5 = vmov 0.0   ;;  %v144_v6 = vld [vmem:[%s211_s1] sm:$0xff]  }
   0x5   :  { %132 = vmatprep.subr.bf16.mxu0 %v169_v5  ;;  %vm170_vm1 = vmmov 0   ;;  %vm39_vm2 = vcmask 257024   ;;  %v125_v20 = vld [vmem:[%s212_s2] ss:$0 sm:$0xff]  ;;  %s171_s18 = smov [#allocation3]   ;;  %vm109_vm3 = vcmask 130048  }
   0x6   :  { %133 = vmatpush3.bf16.msra.mxu0 %v143_v4  ;;  %136 = vmatprep.mubr.msk.bf16.mxu0 %vm170_vm1, %v169_v5  ;;  %s117_s19 = sshll.u32 %s171_s18, 4  ;;  %s118_s19 = int_to_ptr.vmem [resolvable:$true] %s117_s19 }
   0x7   :  { %27 = vadd.xlane.f32.xlu0 %v26_v3  ;;  %134 = vmatprep.subr.bf16.mxu0 %v169_v5  ;;  %s147_s20 = scalar_lea.vmem %s118_s19, 128  ;;  %p152_p1 = scmp.lt.s32.totalorder %s118_s19, %s118_s19 }
   0x8   :  { %p148_p0 = scmp.ne.s32.totalorder %s118_s19, %s147_s20  ;;  %p153_p2 = scmp.lt.s32.totalorder %s147_s20, %s147_s20 }
   0xa   :  { %135 = vmatpush3.bf16.msra.mxu0 %v144_v6  ;;  %p154_p3 = por %p153_p2, %p152_p1 }
   0xc   :  { %p155_p4 = pnand %p154_p3, %p148_p0 }
  0x8c   :  { %v24_v7 = vpop.xlane.xlu0 %23 }
  0x8d   :  { %v29_v8 = vmul.f32 0.03125, %v24_v7 }
  0x8f   :  { %v31_v10 = vmul.f32 %v29_v8, %v29_v8  ;;  %v36_v15 = vsub.f32 %v20_v0, %v29_v8 }
  0x90   :  { %v28_v9 = vpop.xlane.xlu0 %27 }
  0x91   :  { %v30_v11 = vmul.f32 0.03125, %v28_v9 }
  0x93   :  { %v32_v12 = vsub.f32 %v30_v11, %v31_v10 }
  0x95   :  { %v33_v13 = vmax.f32 %v32_v12, 0.0 }
  0x97   :  { %v34_v14 = vadd.f32 1e-05, %v33_v13 }
  0x99   :  { %145 = vrsqrt.f32 %v34_v14 }
  0xa6   :  { %v146_v16 = vpop.eup %145 }
  0xa7   :  { %v37_v17 = vmul.f32 %v146_v16, %v36_v15 }
  0xa9   :  { %v38_v18 = vpack.c.bf16 %v37_v17, %v37_v17 }
  0xab   :  { %40 = vst.msk [vmem:[#allocation2] sm:$0xf] %vm39_vm2, %v38_v18 }
  0xb2   :  { %v41_v19 = vld [vmem:[#allocation2] sm:$0xf] }
  0xb3   :  { %137 = vmatmul.mubr.msk.bf16.vlgmr.msra.gmra.mxu0 %vm21_vm0, %v41_v19 }
 0x173   :  { %v103_v21 = vpop.f32.mrf.mxu0 }
 0x174   :  { %v104_v22 = vadd.f32 %v125_v20, %v103_v21 }
 0x175   :  { %v138_v23 = vpop.f32.mrf.mxu0 }
 0x176   :  { %110 = vst.msk [vmem:[#allocation3] sm:$0xff] %vm109_vm3, %v104_v22 }
 0x177   :  { %v106_v24 = vpop.f32.mrf.mxu0 }
 0x178   :  { %158 = shalt.err (!%p155_p4)
}
 0x179   :  { %120 = dma.vmem_to_hbm [thread:$0]  %s118_s19, 128, %s213_s3, [#allocation4]   ;;  %v139_v25 = vpop.f32.mrf.mxu0 }
 0x17a   :  { %167 = dma.done.wait [#allocation4], 128  }
 0x17b   :  { %168 = vsyncadd [#allocation4], 4294967168 }
 0x17c   :  { %124 = vsyncpa [#allocation4], 1 }

</bundles_post_ra>
